<compile_context>
chip_gen: v6e
topology: v6e:2x2x1
jax: 0.10.0
libtpu: 0.0.40
codegen_flags: <defaults>
</compile_context>

<pallas_src>
import jax
import jax.numpy as jnp
from jax import lax
from jax.experimental import pallas as pl
from jax.experimental.pallas import tpu as pltpu

LANE = 128
MAX_BLOCK_ROWS = 2048    # (2048, 128) f32 block = 1 MiB per input per buffer
NUM_CORE_SPLITS = 2      # leading "parallel" axis: both TCs on v7x, no-op elsewhere


def _dice_partial_sums(x2, t2):
    """Streams the (rows, 128) slabs x2 / t2 once through VMEM and returns
    f32[num_splits, 2, 128] lane partials:
        out[:, 0, :].sum() == sum(x * t)            (intersection)
        out[:, 1, :].sum() == sum(x) + sum(t)       (union)
    """
    rows = x2.shape[0]
    block_rows = min(MAX_BLOCK_ROWS, rows)
    total_blocks = pl.cdiv(rows, block_rows)
    num_splits = min(NUM_CORE_SPLITS, total_blocks)
    bps = pl.cdiv(total_blocks, num_splits)            # blocks per split (core)
    has_phantom = num_splits * bps != total_blocks     # odd block count -> one dup block
    needs_mask = (num_splits * bps * block_rows) != rows

    def in_index_map(c, i):
        b = c * bps + i
        if has_phantom:
            # Phantom grid step re-reads the last real block; its contribution
            # is fully masked to zero inside the kernel.
            b = jnp.minimum(b, total_blocks - 1)
        return (b, 0)

    def kernel(x_ref, t_ref, o_ref):
        c = pl.program_id(0)
        i = pl.program_id(1)

        @pl.when(i == 0)
        def _init():
            o_ref[...] = jnp.zeros_like(o_ref)

        x = x_ref[...].astype(jnp.float32)
        t = t_ref[...].astype(jnp.float32)

        if needs_mask:
            # Zero rows past the end of the data (covers both the partial tail
            # block and the duplicated phantom block).  Mask BEFORE the
            # multiply so garbage (possibly NaN) OOB data cannot propagate.
            b = c * bps + i
            valid = rows - b * block_rows
            rid = lax.broadcasted_iota(jnp.int32, (block_rows, LANE), 0)
            keep = rid < valid
            x = jnp.where(keep, x, 0.0)
            t = jnp.where(keep, t, 0.0)

        # Sublane-axis reductions land on the (otherwise idle) XLU; the
        # accumulator RMW is a single (2, 128) tile per step.
        o_ref[0:1, :] += jnp.sum(x * t, axis=0, keepdims=True)
        o_ref[1:2, :] += jnp.sum(x + t, axis=0, keepdims=True)

    bytes_accessed = (x2.size * x2.dtype.itemsize
                      + t2.size * t2.dtype.itemsize
                      + num_splits * 2 * LANE * 4)
    cost = pl.CostEstimate(flops=4 * x2.size, transcendentals=0,
                           bytes_accessed=bytes_accessed)

    return pl.pallas_call(
        kernel,
        out_shape=jax.ShapeDtypeStruct((num_splits, 2, LANE), jnp.float32),
        grid_spec=pltpu.PrefetchScalarGridSpec(
            num_scalar_prefetch=0,
            grid=(num_splits, bps),
            in_specs=[
                pl.BlockSpec((block_rows, LANE), in_index_map),
                pl.BlockSpec((block_rows, LANE), in_index_map),
            ],
            out_specs=pl.BlockSpec((None, 2, LANE), lambda c, i: (c, 0, 0)),
        ),
        compiler_params=pltpu.CompilerParams(
            dimension_semantics=("parallel", "arbitrary")),
        cost_estimate=cost,
    )(x2, t2)


def dice_topk10_loss(inputs, targets, topk=10):
    """Forward pass of DiceTopK10Loss (global dice over the flattened tensors)."""
    del topk  # see TODO at the bottom of this function
    smooth = 1e-05

    # inputs.view(-1) / targets.view(-1); keep native dtypes (the kernel casts
    # to f32 on the fly, so bf16 / int masks stream fewer HBM bytes).
    x = inputs.reshape(-1)
    t = targets.reshape(-1)
    n = x.shape[0]

    rem = n % LANE
    n_main = n - rem
    rows = n_main // LANE

    intersection = jnp.float32(0.0)
    union = jnp.float32(0.0)

    if rows > 0:
        if rem == 0:
            x2 = x.reshape(rows, LANE)              # metadata-only reshape
            t2 = t.reshape(rows, LANE)
        else:
            # TODO(synk): lane-unaligned numel pays one extra HBM copy for this
            # prefix slice; lane-aligned shapes (the common case) are zero-copy.
            x2 = x[:n_main].reshape(rows, LANE)
            t2 = t[:n_main].reshape(rows, LANE)
        partials = _dice_partial_sums(x2, t2)       # (num_splits, 2, 128) f32
        intersection = jnp.sum(partials[:, 0, :])
        union = jnp.sum(partials[:, 1, :])

    if rem:
        # < 128 leftover elements; this tiny reduce fuses with the scalar math.
        xr = x[n_main:].astype(jnp.float32)
        tr = t[n_main:].astype(jnp.float32)
        intersection = intersection + jnp.sum(xr * tr)
        union = union + jnp.sum(xr + tr)

    dice_loss = (2.0 * intersection + smooth) / (union + smooth)

    # torch.topk(1 - dice_loss, k) on a 0-d tensor followed by mean() is the
    # scalar itself (PyTorch would in fact raise for k > 1 on a 0-d tensor).
    # TODO(synk): documented deviation: loss = mean(1 - dice_loss) = 1 - dice_loss.
    return jnp.mean(1.0 - dice_loss)


def _reference(inputs, targets):
    smooth = 1e-05
    x = inputs.reshape(-1).astype(jnp.float32)
    t = targets.reshape(-1).astype(jnp.float32)
    inter = jnp.sum(x * t)
    union = jnp.sum(x) + jnp.sum(t)
    return 1.0 - (2.0 * inter + smooth) / (union + smooth)


if __name__ == "__main__":
    key = jax.random.PRNGKey(0)
    k1, k2, k3, k4, k5, k6 = jax.random.split(key, 6)

    # Primary small case: NCHW probabilities vs. binary masks (single block).
    inputs = jax.nn.sigmoid(jax.random.normal(k1, (2, 4, 16, 16), jnp.float32))
    targets = (jax.random.uniform(k2, (2, 4, 16, 16)) > 0.5).astype(jnp.float32)
    loss = jax.block_until_ready(dice_topk10_loss(inputs, targets, topk=10))
    ref = _reference(inputs, targets)
    assert jnp.allclose(loss, ref, atol=1e-5, rtol=1e-5), (loss, ref)

    # Multi-block case: 2080 rows -> 2 blocks over the 2-way core split, with
    # the partial tail block masked in-kernel.
    inputs2 = jax.nn.sigmoid(jax.random.normal(k3, (4, 4, 128, 130), jnp.float32))
    targets2 = (jax.random.uniform(k4, (4, 4, 128, 130)) > 0.5).astype(jnp.float32)
    loss2 = jax.block_until_ready(dice_topk10_loss(inputs2, targets2, topk=10))
    ref2 = _reference(inputs2, targets2)
    assert jnp.allclose(loss2, ref2, atol=1e-5, rtol=2e-5), (loss2, ref2)

    # Lane-unaligned numel + bf16 inputs (native-dtype streaming, in-kernel cast,
    # <128-element remainder handled in the wrapper).
    inputs3 = jax.nn.sigmoid(jax.random.normal(k5, (2, 3, 15, 17), jnp.bfloat16))
    targets3 = (jax.random.uniform(k6, (2, 3, 15, 17)) > 0.5).astype(jnp.float32)
    loss3 = jax.block_until_ready(dice_topk10_loss(inputs3, targets3, topk=10))
    ref3 = _reference(inputs3, targets3)
    assert jnp.allclose(loss3, ref3, atol=1e-5, rtol=2e-5), (loss3, ref3)

    print("KERNEL_OK")
</pallas_src>

<mosaic_0001>
module attributes {stable_mosaic.version = 11 : i64} {
  func.func @kernel(%arg0: i32, %arg1: i32, %arg2: memref<16x128xf32, #tpu.memory_space<vmem>>, %arg3: memref<16x128xf32, #tpu.memory_space<vmem>>, %arg4: memref<1x2x128xf32, #tpu.memory_space<vmem>>) attributes {dimension_semantics = [#tpu.dimension_semantics<parallel>, #tpu.dimension_semantics<arbitrary>], iteration_bounds = array<i64: 1, 1>, scalar_prefetch = 0 : i64, scratch_operands = 0 : i64, tpu.core_type = #tpu.core_type<tc>, window_params = [{transform_indices = @transform_0, window_bounds = array<i64: 16, 128>}, {transform_indices = @transform_1, window_bounds = array<i64: 16, 128>}, {transform_indices = @transform_2, window_bounds = array<i64: 1, 2, 128>}]} {
    %c0_i32 = arith.constant 0 : i32
    %0 = arith.cmpi eq, %arg1, %c0_i32 : i32
    %1 = arith.extui %0 : i1 to i32
    %c0_i32_0 = arith.constant 0 : i32
    %2 = arith.cmpi ne, %1, %c0_i32_0 : i32
    scf.if %2 {
      %cst_16 = arith.constant 0.000000e+00 : f32
      %23 = vector.broadcast %cst_16 : f32 to vector<2x128xf32>
      %c0_17 = arith.constant 0 : index
      %c0_18 = arith.constant 0 : index
      %c0_19 = arith.constant 0 : index
      %24 = vector.load %arg4[%c0_17, %c0_18, %c0_19] : memref<1x2x128xf32, #tpu.memory_space<vmem>>, vector<1x2x128xf32>
      %25 = vector.shape_cast %24 : vector<1x2x128xf32> to vector<2x128xf32>
      %26 = vector.shape_cast %23 : vector<2x128xf32> to vector<1x2x128xf32>
      tpu.vector_store %arg4[%c0_17, %c0_18, %c0_19], %26 {strides = array<i32>} : memref<1x2x128xf32, #tpu.memory_space<vmem>>, vector<1x2x128xf32>,
    } else {
    }
    %c0 = arith.constant 0 : index
    %c0_1 = arith.constant 0 : index
    %3 = vector.load %arg2[%c0, %c0_1] : memref<16x128xf32, #tpu.memory_space<vmem>>, vector<16x128xf32>
    %c0_2 = arith.constant 0 : index
    %c0_3 = arith.constant 0 : index
    %4 = vector.load %arg3[%c0_2, %c0_3] : memref<16x128xf32, #tpu.memory_space<vmem>>, vector<16x128xf32>
    %c0_4 = arith.constant 0 : index
    %c0_5 = arith.constant 0 : index
    %c0_6 = arith.constant 0 : index
    %5 = vector.load %arg4[%c0_4, %c0_5, %c0_6] : memref<1x2x128xf32, #tpu.memory_space<vmem>>, vector<1x1x128xf32>
    %6 = vector.shape_cast %5 : vector<1x1x128xf32> to vector<1x128xf32>
    %7 = arith.mulf %3, %4 : vector<16x128xf32>
    %cst = arith.constant dense<0.000000e+00> : vector<128xf32>
    %8 = vector.multi_reduction <add>, %7, %cst [0] : vector<16x128xf32> to vector<128xf32>
    %9 = vector.shape_cast %8 : vector<128xf32> to vector<1x128xf32>
    %10 = arith.addf %6, %9 : vector<1x128xf32>
    %c0_7 = arith.constant 0 : index
    %c0_8 = arith.constant 0 : index
    %c0_9 = arith.constant 0 : index
    %11 = vector.load %arg4[%c0_7, %c0_8, %c0_9] : memref<1x2x128xf32, #tpu.memory_space<vmem>>, vector<1x1x128xf32>
    %12 = vector.shape_cast %11 : vector<1x1x128xf32> to vector<1x128xf32>
    %13 = vector.shape_cast %10 : vector<1x128xf32> to vector<1x1x128xf32>
    tpu.vector_store %arg4[%c0_7, %c0_8, %c0_9], %13 {strides = array<i32>} : memref<1x2x128xf32, #tpu.memory_space<vmem>>, vector<1x1x128xf32>,
    %c0_10 = arith.constant 0 : index
    %c1 = arith.constant 1 : index
    %c0_11 = arith.constant 0 : index
    %14 = vector.load %arg4[%c0_10, %c1, %c0_11] : memref<1x2x128xf32, #tpu.memory_space<vmem>>, vector<1x1x128xf32>
    %15 = vector.shape_cast %14 : vector<1x1x128xf32> to vector<1x128xf32>
    %16 = arith.addf %3, %4 : vector<16x128xf32>
    %cst_12 = arith.constant dense<0.000000e+00> : vector<128xf32>
    %17 = vector.multi_reduction <add>, %16, %cst_12 [0] : vector<16x128xf32> to vector<128xf32>
    %18 = vector.shape_cast %17 : vector<128xf32> to vector<1x128xf32>
    %19 = arith.addf %15, %18 : vector<1x128xf32>
    %c0_13 = arith.constant 0 : index
    %c1_14 = arith.constant 1 : index
    %c0_15 = arith.constant 0 : index
    %20 = vector.load %arg4[%c0_13, %c1_14, %c0_15] : memref<1x2x128xf32, #tpu.memory_space<vmem>>, vector<1x1x128xf32>
    %21 = vector.shape_cast %20 : vector<1x1x128xf32> to vector<1x128xf32>
    %22 = vector.shape_cast %19 : vector<1x128xf32> to vector<1x1x128xf32>
    tpu.vector_store %arg4[%c0_13, %c1_14, %c0_15], %22 {strides = array<i32>} : memref<1x2x128xf32, #tpu.memory_space<vmem>>, vector<1x1x128xf32>,
    return
  }
  func.func @transform_0(%arg0: i32, %arg1: i32) -> (i32, i32) {
    %c1_i32 = arith.constant 1 : i32
    %0 = arith.muli %arg0, %c1_i32 : i32
    %1 = arith.addi %0, %arg1 : i32
    %c0_i32 = arith.constant 0 : i32
    %c0_i32_0 = arith.constant 0 : i32
    return %1, %c0_i32 : i32, i32
  }
  func.func @transform_1(%arg0: i32, %arg1: i32) -> (i32, i32) {
    %c1_i32 = arith.constant 1 : i32
    %0 = arith.muli %arg0, %c1_i32 : i32
    %1 = arith.addi %0, %arg1 : i32
    %c0_i32 = arith.constant 0 : i32
    %c0_i32_0 = arith.constant 0 : i32
    return %1, %c0_i32 : i32, i32
  }
  func.func @transform_2(%arg0: i32, %arg1: i32) -> (i32, i32, i32) {
    %c0_i32 = arith.constant 0 : i32
    %c0_i32_0 = arith.constant 0 : i32
    %c0_i32_1 = arith.constant 0 : i32
    return %arg0, %c0_i32, %c0_i32_0 : i32, i32, i32
  }
}

</mosaic_0001>

<bundles_post_ra>
// kernel: tpu_custom_call.1
= control target key start
LH: loop header
LB: loop body
LE: loop exit
PB: predicated region body
PF: predicated region fallthrough
CT: control target
= control target key end

     0   :  { %7 = vsyncpa [#allocation3], 0  ;;  %s203_s0 = inlined_call_operand.hbm [shape: f32[16,128], index: 0, kind: input, shape index: {}]   ;;  %s204_s1 = inlined_call_operand.hbm [shape: f32[16,128], index: 1, kind: input, shape index: {}]   ;;  %s205_s2 = inlined_call_operand.hbm [shape: f32[1,2,128], index: 2, kind: output, shape index: {}]  }
   0x1   :  { %8 = vsyncpa [#allocation6], 0 }
   0x2   :  { %9 = vsyncpa [#allocation4], 0  ;;  %s173_s9 = smov [#allocation2]  }
   0x3   :  { %s19_s10 = sshll.u32 %s173_s9, 4  ;;  %s20_s10 = int_to_ptr.vmem [resolvable:$true] %s19_s10 }
   0x4   :  { %s115_s11 = scalar_lea.vmem %s20_s10, 256  ;;  %p120_p1 = scmp.lt.s32.totalorder %s20_s10, %s20_s10 }
   0x5   :  { %p116_p0 = scmp.ne.s32.totalorder %s20_s10, %s115_s11  ;;  %p121_p2 = scmp.lt.s32.totalorder %s115_s11, %s115_s11 }
   0x7   :  { %p122_p3 = por %p121_p2, %p120_p1 }
   0x9   :  { %p123_p4 = pnand %p122_p3, %p116_p0 }
   0xb   :  { %126 = shalt.err (!%p123_p4)
}
   0xc   :  { %s174_s12 = smov 128   ;;  %s175_s13 = smov 8  }
   0xd   :  { %25 = dma.hbm_to_vmem [thread:$0]  %s203_s0, 256, %s20_s10, [#allocation3], %s174_s12, %s174_s12, %s175_s13  }
   0xe   :  { %s176_s16 = smov [#allocation5]  }
   0xf   :  { %s35_s17 = sshll.u32 %s176_s16, 4  ;;  %s36_s17 = int_to_ptr.vmem [resolvable:$true] %s35_s17 }
  0x10   :  { %s135_s18 = scalar_lea.vmem %s36_s17, 256  ;;  %p140_p6 = scmp.lt.s32.totalorder %s36_s17, %s36_s17 }
  0x11   :  { %p136_p5 = scmp.ne.s32.totalorder %s36_s17, %s135_s18  ;;  %p141_p7 = scmp.lt.s32.totalorder %s135_s18, %s135_s18 }
  0x13   :  { %p142_p8 = por %p141_p7, %p140_p6 }
  0x15   :  { %p143_p9 = pnand %p142_p8, %p136_p5 }
  0x17   :  { %146 = shalt.err (!%p143_p9)
}
  0x18   :  { %41 = dma.hbm_to_vmem [thread:$0]  %s204_s1, 256, %s36_s17, [#allocation6], %s174_s12, %s174_s12, %s175_s13  }
  0x19   :  { %167 = dma.done.wait [#allocation3], 256  }
  0x1a   :  { %168 = vsyncadd [#allocation3], 4294967040 }
  0x1b   :  { %169 = dma.done.wait [#allocation6], 256  }
  0x1c   :  { %170 = vsyncadd [#allocation6], 4294967040  ;;  %v177_v0 = vmov 0.0   ;;  %v57_v1 = vld [vmem:[#allocation2] sm:$0xff]  ;;  %v58_v2 = vld [vmem:[#allocation2 + $0x8] sm:$0xff]  ;;  %s178_s0 = smov [#allocation7]  }
  0x1d   :  { %56 = vst [vmem:[#allocation7] sm:$0x3] %v177_v0  ;;  %v59_v3 = vld [vmem:[#allocation5] sm:$0xff]  ;;  %v60_v4 = vld [vmem:[#allocation5 + $0x8] sm:$0xff]  ;;  %s91_s1 = sshll.u32 %s178_s0, 4  ;;  %s92_s1 = int_to_ptr.vmem [resolvable:$true] %s91_s1 }
  0x1e   :  { %v62_v5 = vmul.f32 %v59_v3, %v57_v1  ;;  %v74_v6 = vadd.f32 %v59_v3, %v57_v1  ;;  %v63_v7 = vmul.f32 %v60_v4, %v58_v2  ;;  %v75_v8 = vadd.f32 %v60_v4, %v58_v2  ;;  %s147_s21 = scalar_lea.vmem %s92_s1, 32  ;;  %p152_p11 = scmp.lt.s32.totalorder %s92_s1, %s92_s1 }
  0x1f   :  { %p148_p10 = scmp.ne.s32.totalorder %s92_s1, %s147_s21  ;;  %p153_p12 = scmp.lt.s32.totalorder %s147_s21, %s147_s21 }
  0x20   :  { %v64_v9 = vadd.f32 %v63_v7, %v62_v5  ;;  %v76_v10 = vadd.f32 %v75_v8, %v74_v6 }
  0x21   :  { %p154_p13 = por %p153_p12, %p152_p11 }
  0x22   :  { %v65_v11 = vrot.slane %v64_v9, 4  ;;  %v77_v12 = vrot.slane %v76_v10, 4 }
  0x23   :  { %p155_p0 = pnand %p154_p13, %p148_p10 }
  0x24   :  { %v66_v13 = vadd.f32 %v65_v11, %v64_v9  ;;  %v78_v14 = vadd.f32 %v77_v12, %v76_v10  ;;  %v61_v21 = vld [vmem:[#allocation7] sm:$0x1]  ;;  %v73_v22 = vld [vmem:[#allocation7 + $0x1] sm:$0x1] }
  0x26   :  { %v67_v15 = vrot.slane %v66_v13, 2  ;;  %v79_v16 = vrot.slane %v78_v14, 2 }
  0x28   :  { %v68_v17 = vadd.f32 %v67_v15, %v66_v13  ;;  %v80_v18 = vadd.f32 %v79_v16, %v78_v14 }
  0x2a   :  { %v69_v19 = vrot.slane %v68_v17, 1  ;;  %v81_v20 = vrot.slane %v80_v18, 1 }
  0x2c   :  { %v70_v23 = vadd.f32 %v69_v19, %v68_v17  ;;  %v82_v24 = vadd.f32 %v81_v20, %v80_v18 }
  0x2e   :  { %v71_v25 = vadd.f32 %v70_v23, %v61_v21  ;;  %v83_v26 = vadd.f32 %v82_v24, %v73_v22 }
  0x30   :  { %72 = vst [vmem:[#allocation7] sm:$0x1] %v71_v25  ;;  %84 = vst [vmem:[#allocation7 + $0x1] sm:$0x1] %v83_v26 }
  0x31   :  { %158 = shalt.err (!%p155_p0)
}
  0x32   :  { %94 = dma.vmem_to_hbm [thread:$0]  %s92_s1, 32, %s205_s2, [#allocation4]  }
  0x33   :  { %171 = dma.done.wait [#allocation4], 32  }
  0x34   :  { %172 = vsyncadd [#allocation4], 4294967264 }
  0x35   :  { %98 = vsyncpa [#allocation3], 1 }
  0x36   :  { %99 = vsyncpa [#allocation6], 1 }
  0x37   :  { %100 = vsyncpa [#allocation4], 1 }

</bundles_post_ra>
